<compile_context>
chip_gen: v7x
topology: tpu7x:2x2x1
jax: 0.10.0
libtpu: 0.0.40
codegen_flags: <defaults>
</compile_context>

<pallas_src>
import functools

import jax
import jax.numpy as jnp
from jax.experimental import pallas as pl
from jax.experimental.pallas import tpu as pltpu


def _round_up(x, m):
    return ((x + m - 1) // m) * m


def _gcn_kernel(adj_ref, y_ref, b_ref, o_ref, acc_ref, *, y_resident):
    k = pl.program_id(1)

    @pl.when(k == 0)
    def _():
        acc_ref[...] = jnp.zeros_like(acc_ref)

    # int8 0/1 adjacency -> bf16 so the dot is a single-pass bf16 x bf16 MXU
    # matmul.  Two-step cast (i8 -> f32 -> bf16) lowers robustly on every Mosaic
    # generation; it is cheap VPU work hidden under the (memory-bound) A DMA.
    a = adj_ref[...].astype(jnp.float32).astype(jnp.bfloat16)

    if y_resident:
        # Y lives fully in VMEM (DMA'd once); slice the current reduction block.
        tk = adj_ref.shape[1]
        y = y_ref[pl.ds(pl.multiple_of(k * tk, 128), tk), :]
    else:
        y = y_ref[...]

    acc_ref[...] += jnp.dot(a, y, preferred_element_type=jnp.float32)

    @pl.when(k == pl.num_programs(1) - 1)
    def _():
        # Bias added exactly once, on the finished f32 accumulator.
        o_ref[...] = (acc_ref[...] + b_ref[...]).astype(o_ref.dtype)


def gcn_layer(adj, feature, weight, bias, *, tm=512, tk=1024,
              y_resident_max_bytes=8 * 1024 * 1024):
    """adj: [N, N] 0/1 (row = dst, col = src), feature: [N, in_feats],
    weight: [out_feats, in_feats] (nn.Linear layout), bias: [out_feats].
    Returns [N, out_feats] = (adj @ feature) @ weight.T + bias.

    NOTE: the low-precision (int8) adjacency stream is exact only for an
    unweighted 0/1 adjacency (as produced by DGL copy_u/sum)."""
    n, in_feats = feature.shape
    out_feats = weight.shape[0]
    out_dtype = feature.dtype

    # Reassociation (wrapper glue, small N*in*out matmul): Y = X @ W.T in f32,
    # bias deferred; aggregation input then cast to bf16 (accumulation stays f32).
    y = jnp.dot(feature, weight.T, preferred_element_type=jnp.float32)

    # Lane-dense feature dim for Y / bias / output (unmasked stores).
    f_pad = _round_up(out_feats, 128)

    # Tile sizes: tm multiple of 32 (int8 sublane packing), tk multiple of 128,
    # capped at the padded problem size so tiny graphs don't over-pad.
    tm = min(tm, _round_up(n, 32))
    tk = min(tk, _round_up(n, 128))
    if _round_up(n, 32) <= tm and n > 32:
        # Whole row dim fits one tile -> split in two so v7x's 2 TensorCores both
        # get work on the "parallel" row axis (harmless on 1-TC v5e/v6e).
        tm = _round_up((n + 1) // 2, 32)
    n_rows = _round_up(n, tm)   # padded destination-node dim
    n_cols = _round_up(n, tk)   # padded source-node (reduction) dim

    # Zero-padding is semantically inert: extra A columns are 0 (no contribution),
    # extra A rows only produce output rows that get sliced off.
    adj_i8 = adj if adj.dtype == jnp.int8 else adj.astype(jnp.int8)
    adj_p = jnp.zeros((n_rows, n_cols), jnp.int8).at[:n, :n].set(adj_i8)
    y_p = (jnp.zeros((n_cols, f_pad), jnp.bfloat16)
           .at[:n, :out_feats].set(y.astype(jnp.bfloat16)))
    b_p = jnp.zeros((1, f_pad), jnp.float32).at[0, :out_feats].set(
        bias.astype(jnp.float32))

    grid = (n_rows // tm, n_cols // tk)

    y_bytes = n_cols * f_pad * 2
    y_resident = y_bytes <= y_resident_max_bytes
    if y_resident:
        # Constant block index -> Pallas DMAs Y exactly once; kernel slices it.
        y_spec = pl.BlockSpec((n_cols, f_pad), lambda i, k: (0, 0))
        y_traffic = y_bytes
    else:
        # Fallback: stream (tk, f_pad) Y tiles (re-fetched once per row tile).
        y_spec = pl.BlockSpec((tk, f_pad), lambda i, k: (k, 0))
        y_traffic = (n_rows // tm) * n_cols * f_pad * 2

    cost = pl.CostEstimate(
        flops=2 * n_rows * n_cols * f_pad,
        transcendentals=0,
        bytes_accessed=(adj_p.size * 1                     # int8 A stream
                        + y_traffic                        # bf16 Y traffic
                        + n_rows * f_pad * jnp.dtype(out_dtype).itemsize
                        + f_pad * 4),
    )

    out_p = pl.pallas_call(
        functools.partial(_gcn_kernel, y_resident=y_resident),
        out_shape=jax.ShapeDtypeStruct((n_rows, f_pad), out_dtype),
        grid_spec=pltpu.PrefetchScalarGridSpec(
            num_scalar_prefetch=0,
            grid=grid,
            in_specs=[
                pl.BlockSpec((tm, tk), lambda i, k: (i, k)),  # A tile (streamed, int8)
                y_spec,                                       # Y (resident or streamed)
                pl.BlockSpec((1, f_pad), lambda i, k: (0, 0)),  # bias (resident)
            ],
            out_specs=pl.BlockSpec((tm, f_pad), lambda i, k: (i, 0)),
            scratch_shapes=[pltpu.VMEM((tm, f_pad), jnp.float32)],
        ),
        compiler_params=pltpu.CompilerParams(
            dimension_semantics=("parallel", "arbitrary"),
            # 48 MiB: generous on v5e/v6e (128 MiB physical), safe on v7x (64 MiB).
            vmem_limit_bytes=48 * 1024 * 1024,
        ),
        cost_estimate=cost,
    )(adj_p, y_p, b_p)

    return out_p[:n, :out_feats]


if __name__ == "__main__":
    key = jax.random.PRNGKey(0)
    k_adj, k_feat, k_w, k_b = jax.random.split(key, 4)

    # Small graph; N deliberately not tile-aligned and out_feats < 128 so the
    # padding + multi-tile (2x2 grid with tm=tk=128) paths are exercised.
    N, IN_FEATS, OUT_FEATS = 200, 64, 48

    # Deterministic random dense 0/1 adjacency (row i = incoming edges of node i).
    adj = (jax.random.uniform(k_adj, (N, N)) < 0.3).astype(jnp.float32)
    feature = jax.random.normal(k_feat, (N, IN_FEATS), dtype=jnp.float32)

    # nn.Linear-style deterministic init: U(-1/sqrt(in), 1/sqrt(in))
    bound = 1.0 / (IN_FEATS ** 0.5)
    weight = jax.random.uniform(
        k_w, (OUT_FEATS, IN_FEATS), minval=-bound, maxval=bound, dtype=jnp.float32
    )
    bias = jax.random.uniform(
        k_b, (OUT_FEATS,), minval=-bound, maxval=bound, dtype=jnp.float32
    )

    # Pure-JAX reference.
    ref = (adj @ feature) @ weight.T + bias

    # Path 1: resident-Y kernel (default).
    out = jax.block_until_ready(
        gcn_layer(adj, feature, weight, bias, tm=128, tk=128)
    )
    assert out.shape == (N, OUT_FEATS)
    assert jnp.allclose(out, ref, atol=5e-2, rtol=2e-2), float(
        jnp.max(jnp.abs(out - ref))
    )

    # Path 2: streamed-Y fallback kernel (forced), same result.
    out2 = jax.block_until_ready(
        gcn_layer(adj, feature, weight, bias, tm=128, tk=128,
                  y_resident_max_bytes=0)
    )
    assert jnp.allclose(out2, ref, atol=5e-2, rtol=2e-2), float(
        jnp.max(jnp.abs(out2 - ref))
    )

    print("KERNEL_OK")
</pallas_src>

<mosaic_0001>
module attributes {stable_mosaic.version = 11 : i64} {
  func.func @_gcn_kernel(%arg0: i32, %arg1: i32, %arg2: memref<128x128xi8, #tpu.memory_space<vmem>>, %arg3: memref<256x128xbf16, #tpu.memory_space<vmem>>, %arg4: memref<1x128xf32, #tpu.memory_space<vmem>>, %arg5: memref<128x128xf32, #tpu.memory_space<vmem>>, %arg6: memref<128x128xf32, #tpu.memory_space<vmem>>) attributes {dimension_semantics = [#tpu.dimension_semantics<parallel>, #tpu.dimension_semantics<arbitrary>], iteration_bounds = array<i64: 2, 2>, scalar_prefetch = 0 : i64, scratch_operands = 1 : i64, tpu.core_type = #tpu.core_type<tc>, window_params = [{transform_indices = @transform_0, window_bounds = array<i64: 128, 128>}, {pipeline_mode = #tpu.pipeline_mode<synchronous>, transform_indices = @transform_1, window_bounds = array<i64: 256, 128>}, {pipeline_mode = #tpu.pipeline_mode<synchronous>, transform_indices = @transform_2, window_bounds = array<i64: 1, 128>}, {transform_indices = @transform_3, window_bounds = array<i64: 128, 128>}]} {
    %c0_i32 = arith.constant 0 : i32
    %0 = arith.cmpi eq, %arg1, %c0_i32 : i32
    %1 = arith.extui %0 : i1 to i32
    %c0_i32_0 = arith.constant 0 : i32
    %2 = arith.cmpi ne, %1, %c0_i32_0 : i32
    scf.if %2 {
      %cst_8 = arith.constant 0.000000e+00 : f32
      %17 = vector.broadcast %cst_8 : f32 to vector<128x128xf32>
      %c0_9 = arith.constant 0 : index
      %c0_10 = arith.constant 0 : index
      %18 = vector.load %arg6[%c0_9, %c0_10] : memref<128x128xf32, #tpu.memory_space<vmem>>, vector<128x128xf32>
      tpu.vector_store %arg6[%c0_9, %c0_10], %17 {strides = array<i32>} : memref<128x128xf32, #tpu.memory_space<vmem>>, vector<128x128xf32>,
    } else {
    }
    %c0 = arith.constant 0 : index
    %c0_1 = arith.constant 0 : index
    %3 = vector.load %arg2[%c0, %c0_1] : memref<128x128xi8, #tpu.memory_space<vmem>>, vector<128x128xi8>
    %4 = arith.sitofp %3 : vector<128x128xi8> to vector<128x128xf32>
    %5 = arith.truncf %4 : vector<128x128xf32> to vector<128x128xbf16>
    %c128_i32 = arith.constant 128 : i32
    %6 = arith.muli %arg1, %c128_i32 : i32
    %7 = tpu.assume_multiple %6, 128 : i32
    %8 = arith.index_cast %7 : i32 to index
    %c0_2 = arith.constant 0 : index
    %9 = vector.load %arg3[%8, %c0_2] : memref<256x128xbf16, #tpu.memory_space<vmem>>, vector<128x128xbf16>
    %c0_3 = arith.constant 0 : index
    %c0_4 = arith.constant 0 : index
    %10 = vector.load %arg6[%c0_3, %c0_4] : memref<128x128xf32, #tpu.memory_space<vmem>>, vector<128x128xf32>
    %cst = arith.constant dense<0.000000e+00> : vector<128x128xf32>
    %11 = tpu.matmul %5, %9, %cst {dimension_numbers = #tpu.dot_dimension_numbers<[1], [0], [0], [1], [0, 0, 1, 1], [], []>} : vector<128x128xbf16>, vector<128x128xbf16>, vector<128x128xf32> -> vector<128x128xf32>
    %12 = arith.addf %10, %11 : vector<128x128xf32>
    %c0_5 = arith.constant 0 : index
    %c0_6 = arith.constant 0 : index
    %13 = vector.load %arg6[%c0_5, %c0_6] : memref<128x128xf32, #tpu.memory_space<vmem>>, vector<128x128xf32>
    tpu.vector_store %arg6[%c0_5, %c0_6], %12 {strides = array<i32>} : memref<128x128xf32, #tpu.memory_space<vmem>>, vector<128x128xf32>,
    %c1_i32 = arith.constant 1 : i32
    %14 = arith.cmpi eq, %arg1, %c1_i32 : i32
    %15 = arith.extui %14 : i1 to i32
    %c0_i32_7 = arith.constant 0 : i32
    %16 = arith.cmpi ne, %15, %c0_i32_7 : i32
    scf.if %16 {
      %c0_8 = arith.constant 0 : index
      %c0_9 = arith.constant 0 : index
      %17 = vector.load %arg6[%c0_8, %c0_9] : memref<128x128xf32, #tpu.memory_space<vmem>>, vector<128x128xf32>
      %c0_10 = arith.constant 0 : index
      %c0_11 = arith.constant 0 : index
      %18 = vector.load %arg4[%c0_10, %c0_11] : memref<1x128xf32, #tpu.memory_space<vmem>>, vector<1x128xf32>
      %19 = vector.broadcast %18 : vector<1x128xf32> to vector<128x128xf32>
      %20 = arith.addf %17, %19 : vector<128x128xf32>
      %c0_12 = arith.constant 0 : index
      %c0_13 = arith.constant 0 : index
      %21 = vector.load %arg5[%c0_12, %c0_13] : memref<128x128xf32, #tpu.memory_space<vmem>>, vector<128x128xf32>
      tpu.vector_store %arg5[%c0_12, %c0_13], %20 {strides = array<i32>} : memref<128x128xf32, #tpu.memory_space<vmem>>, vector<128x128xf32>,
    } else {
    }
    return
  }
  func.func @transform_0(%arg0: i32, %arg1: i32) -> (i32, i32) {
    %c0_i32 = arith.constant 0 : i32
    return %arg0, %arg1 : i32, i32
  }
  func.func @transform_1(%arg0: i32, %arg1: i32) -> (i32, i32) {
    %c0_i32 = arith.constant 0 : i32
    %c0_i32_0 = arith.constant 0 : i32
    %c0_i32_1 = arith.constant 0 : i32
    return %c0_i32, %c0_i32_0 : i32, i32
  }
  func.func @transform_2(%arg0: i32, %arg1: i32) -> (i32, i32) {
    %c0_i32 = arith.constant 0 : i32
    %c0_i32_0 = arith.constant 0 : i32
    %c0_i32_1 = arith.constant 0 : i32
    return %c0_i32, %c0_i32_0 : i32, i32
  }
  func.func @transform_3(%arg0: i32, %arg1: i32) -> (i32, i32) {
    %c0_i32 = arith.constant 0 : i32
    %c0_i32_0 = arith.constant 0 : i32
    return %arg0, %c0_i32 : i32, i32
  }
}

</mosaic_0001>

<bundles_post_ra>
// kernel: tpu_custom_call.1
= control target key start
LH: loop header
LB: loop body
LE: loop exit
PB: predicated region body
PF: predicated region fallthrough
CT: control target
= control target key end

     0   :  { %s1392_s0 = inlined_call_operand.hbm [shape: s8[256,256], index: 0, kind: input, shape index: {}]   ;;  %s1393_s1 = inlined_call_operand.hbm [shape: bf16[256,128], index: 1, kind: input, shape index: {}]   ;;  %s1394_s2 = inlined_call_operand.vmem [shape: f32[1,128], index: 2, kind: input, shape index: {}]   ;;  %s1395_s3 = inlined_call_operand.hbm [shape: f32[256,128], index: 3, kind: output, shape index: {}]  }
   0x1   :  { %1407 = sst [smem:[#allocation17_spill]] %s1393_s1 }
   0x2   :  { %8 = vsyncpa [#allocation4], 0 }
   0x3   :  { %10 = vsyncpa [#allocation4 + $0x1], 0 }
   0x4   :  { %11 = vsyncpa [#allocation7], 0 }
   0x5   :  { %12 = vsyncpa [#allocation5], 0 }
   0x6   :  { %14 = vsyncpa [#allocation5 + $0x1], 0  ;;  %s1083_s12 = smov 0   ;;  %s1085_s13 = smov 0  }
   0x7   :  { %s1087_s14 = smov 0   ;;  %s1089_s15 = smov 0  }
   0x8   :  { %s1091_s16 = smov 0   ;;  %s1093_s17 = smov 0  }
   0x9   :  { %s1095_s18 = smov 0   ;;  %s1097_s19 = smov 0  }
   0xa   :  { %s1099_s20 = smov 0   ;;  %s1101_s21 = smov 0  }
   0xb   :  { %s1103_s22 = smov 0  }
   0xc LB: > { %1408 = sst [smem:[#allocation12_spill]] %s1010_s12  ;;  %s640_s23 = sadd.s32 4294967295, %s1050_s22   ;;  %s1050_s22 = sphi %s1103_s22, %s20_s22   ;;  %s1046_s21 = sphi %s1101_s21, %s1442_s21   ;;  %s1042_s20 = sphi %s1099_s20, %s1433_s20   ;;  %s1038_s19 = sphi %s1097_s19, %s1441_s19   ;;  %s1034_s18 = sphi %s1095_s18, %s1432_s18   ;;  %s1030_s17 = sphi %s1093_s17, %s1440_s17   ;;  %s1026_s16 = sphi %s1091_s16, %s1439_s16   ;;  %s1022_s15 = sphi %s1089_s15, %s1438_s15   ;;  %s1018_s14 = sphi %s1087_s14, %s1437_s14   ;;  %s1014_s13 = sphi %s1085_s13, %s1436_s13   ;;  %s1010_s12 = sphi %s1083_s12, %s1435_s12  }
   0xd   : > { %1409 = sst [smem:[#allocation13_spill]] %s1042_s20  ;;  %s641_s24 = sadd.s32 4294967294, %s1050_s22  }
   0xe   : > { %p48_p0 = scmp.ne.s32.totalorder %s1030_s17, %s1026_s16  ;;  %p49_p1 = scmp.eq.s32.totalorder %s1050_s22, 0 }
   0xf   : > { %p54_p2 = scmp.ne.s32.totalorder %s1026_s16, %s1022_s15  ;;  %p1143_p3 = scmp.eq.s32.totalorder %s640_s23, 0 }
  0x10   : > { %p1148_p4 = por %p49_p1, %p48_p0  ;;  %p119_p5 = scmp.ne.s32.totalorder %s1018_s14, %s1014_s13 }
  0x11   : > { %s1410_s26 = scalar_select %p1143_p3, 1, 0 }
  0x12   : > { %p1156_p6 = por %p1143_p3, %p54_p2  ;;  %p120_p7 = scmp.eq.s32.totalorder %s640_s23, 3 }
  0x13   : > { %p125_p8 = scmp.ne.s32.totalorder %s1014_s13, %s1010_s12  ;;  %p126_p9 = scmp.eq.s32.totalorder %s641_s24, 3 }
  0x14   : > { %s1412_s29 = scalar_select %p1156_p6, 1, 0 }
  0x15   : > { %p1162_p10 = por %p120_p7, %p119_p5  ;;  %p642_p11 = scmp.ge.s32.totalorder %s1050_s22, 1 }
  0x16   : > { %p1167_p12 = por %p126_p9, %p125_p8  ;;  %p133_p13 = scmp.lt.s32.totalorder %s1050_s22, 5 }
  0x17   : > { %s1413_s30 = scalar_select %p1162_p10, 1, 0 }
  0x18   : > { %s1414_s4 = scalar_select %p1167_p12, 1, 0 }
  0x19   : > { %p1172_p0 = pnand %p642_p11, %p133_p13  ;;  %s1052_s6 = smov [#allocation6]  }
  0x1a   : > { %1415 = sst [smem:[#allocation14_spill]] %s1414_s4  ;;  %s145_s7 = sshll.u32 %s1052_s6, 4  ;;  %s146_s7 = int_to_ptr.vmem [resolvable:$true] %s145_s7 }
  0x1b   : > { %s1416_s5 = scalar_select %p1172_p0, 1, 0 }
  0x1c   : > { %p745_p1 = pneg %p1172_p0  ;;  %p758_p2 = scmp.lt.s32.totalorder %s1050_s22, 4 }
  0x1d   : > { %s1419_s1 = sld [smem:[#allocation17_spill]] }
  0x1e   : > { %p1181_p5 = pnand %p745_p1, %p1143_p3  ;;  %p1187_p7 = pnand %p758_p2, %p1148_p4 }
  0x20   : > { %s1418_s9 = scalar_select %p1187_p7, 1, 0 }
  0x21   : > { %p868_p9 = pneg %p1181_p5 }
  0x23   : > { %s866_s15 = scalar_lea.hbm %s1419_s1, 2048 }
  0x24   : > { %p867_p8 = scmp.ne.s32.totalorder %s1419_s1, %s866_s15  ;;  %p873_p1 = scmp.lt.u32.totalorder %s866_s15, %s1419_s1 }
  0x26   : > { %p869_p11 = pnand %p868_p9, %p867_p8 }
  0x28   : > { %p870_p13 = pneg %p869_p11 }
  0x2a   : > { %p875_p4 = pnand %p873_p1, %p870_p13 }
  0x2c   : > { %878 = shalt.err (!%p875_p4)
}
  0x2d   : > { %s879_s28 = scalar_lea.vmem %s146_s7, 2048  ;;  %p887_p3 = scmp.lt.s32.totalorder %s146_s7, %s146_s7 }
  0x2e   : > { %p880_p2 = scmp.ne.s32.totalorder %s146_s7, %s879_s28  ;;  %p888_p6 = scmp.lt.s32.totalorder %s879_s28, %s879_s28 }
  0x30   : > { %p882_p12 = pnand %p880_p2, %p868_p9  ;;  %p889_p0 = por %p888_p6, %p887_p3 }
  0x32   : > { %p883_p10 = pneg %p882_p12 }
  0x34   : > { %p890_p7 = pnand %p889_p0, %p883_p10 }
  0x36   : > { %893 = shalt.err (!%p890_p7)
}
  0x37   : > { %s1053_s10 = smov 64   ;;  %s1054_s25 = smov 4  }
  0x38   : > { %748 = dma.hbm_to_vmem [thread:$0]  (!%p1181_p5), %s1419_s1, 2048, %s146_s7, [#allocation7], %s1053_s10, %s1053_s10, %s1054_s25  }
  0x39   : > { %s29_s23 = sadd.s32 1, %s1042_s20  ;;  %s32_s24 = sadd.s32 1, %s1046_s21 }
  0x3a   : > { %p30_p3 = scmp.ge.s32.totalorder %s29_s23, 2  ;;  %s162_s6 = sand.u32 1, %s1030_s17  }
  0x3b   : > { %s645_s28 = sshll.u32 %s162_s6, 5  ;;  %s671_s8 = sshll.u32 %s1046_s21, 3 }
  0x3c   : > { %s1444_s23 = smov (%p30_p3, %s29_s23), 0  ;;  %s1446_s24 = smov (!%p30_p3, %s32_s24), %s1046_s21 }
  0x3d   : > { %1420 = sst [smem:[#allocation15_spill]] %s1444_s23  ;;  %s37_s27 = ssub.s32 %s1042_s20, %s1444_s23 }
  0x3e   : > { %p34_p6 = scmp.ge.s32.totalorder %s1446_s24, 2  ;;  %s172_s4 = sadd.s32 %s1042_s20, %s671_s8 }
  0x3f   : > { %s166_s7 = scalar_lea.vmem [#allocation3], %s645_s28  ;;  %s648_s25 = sshll.u32 %s172_s4, 7 }
  0x40   : > { %s175_s10 = sshll.u32 %s166_s7, 4  ;;  %s1448_s24 = smov (%p34_p6, %s1446_s24), 0  ;;  %s1219_s10 = int_to_ptr.vmem [resolvable:$true] %s175_s10 }
  0x41   : > { %1421 = sst [smem:[#allocation16_spill]] %s1448_s24  ;;  %s36_s11 = ssub.s32 %s1046_s21, %s1448_s24 }
  0x42   : > { %s1226_s12 = scalar_lea.hbm %s1392_s0, %s648_s25  ;;  %s38_s8 = sor.u32 %s37_s27, %s36_s11 }
  0x43   : > { %p107_p10 = scmp.eq.s32.totalorder %s36_s11, 0  ;;  %p39_p12 = scmp.eq.s32.totalorder %s38_s8, 0 }
  0x44   : > { %s1422_s28 = sadd.s32 1, %s1018_s14  ;;  %s1423_s23 = sadd.s32 1, %s1030_s17 }
  0x45   : > { %s1231_s7 = scalar_select %p107_p10, %s1018_s14, %s1422_s28  }
  0x46   : > { %s1236_s4 = scalar_select %p39_p12, %s1030_s17, %s1423_s23  }
  0x47   : > { %s1238_s20 = scalar_lea.sflag [#allocation4], %s162_s6  ;;  %s894_s24 = scalar_lea.hbm %s1226_s12, 512 }
  0x48   : > { %p895_p0 = scmp.ne.s32.totalorder %s1226_s12, %s894_s24  ;;  %p1424_p5 = scmp.ne.s32.totalorder %s1418_s9, 0 }
  0x49   : > { %s899_s25 = scalar_lea.hbm %s1392_s0, 2048  ;;  %p900_p11 = scmp.lt.u32.totalorder %s1226_s12, %s1392_s0 }
  0x4a   : > { %p896_p7 = pneg %p1424_p5  ;;  %p901_p13 = scmp.lt.u32.totalorder %s899_s25, %s894_s24 }
  0x4b   : > { %p903_p4 = scmp.lt.u32.totalorder %s894_s24, %s1226_s12 }
  0x4c   : > { %p897_p8 = pnand %p896_p7, %p895_p0  ;;  %p902_p1 = por %p901_p13, %p900_p11 }
  0x4e   : > { %p898_p9 = pneg %p897_p8  ;;  %p904_p2 = por %p903_p4, %p902_p1 }
  0x50   : > { %p905_p3 = pnand %p904_p2, %p898_p9 }
  0x52   : > { %908 = shalt.err (!%p905_p3)
}
  0x53   : > { %s909_s23 = scalar_lea.vmem %s1219_s10, 512  ;;  %s1055_s6 = smov [#allocation3]  }
  0x54   : > { %p910_p6 = scmp.ne.s32.totalorder %s1219_s10, %s909_s23  ;;  %s914_s8 = sshll.u32 %s1055_s6, 4  ;;  %s915_s8 = int_to_ptr.vmem [resolvable:$false] %s914_s8 }
  0x55   : > { %s916_s28 = scalar_lea.vmem %s915_s8, 1024  ;;  %p917_p0 = scmp.lt.s32.totalorder %s1219_s10, %s915_s8 }
  0x56   : > { %p912_p10 = pnand %p910_p6, %p896_p7  ;;  %p918_p8 = scmp.lt.s32.totalorder %s916_s28, %s909_s23 }
  0x58   : > { %p913_p12 = pneg %p912_p10  ;;  %p919_p11 = por %p918_p8, %p917_p0 }
  0x5a   : > { %p920_p13 = pnand %p919_p11, %p913_p12 }
  0x5c   : > { %923 = shalt.err (!%p920_p13)
}
  0x5d   : > { %s1056_s24 = smov 256   ;;  %s1057_s1 = smov 128  }
  0x5e   : > { %s1058_s27 = smov 8   ;;  %p1425_p7 = scmp.ne.s32.totalorder %s1416_s5, 0 }
  0x5f   : > { %752 = dma.hbm_to_vmem [thread:$0]  (!%p1424_p5), %s1226_s12, 512, %s1219_s10, %s1238_s20, %s1056_s24, %s1057_s1, %s1058_s27  }
  0x60   : > { %187 = sbr.rel (%p1425_p7) target bundleno = 417 (0x1a1), region = 32  ;;  %s189_s25 = sand.u32 (!%p1425_p7), 1, %s1026_s16  }
  0x61   : > { %s650_s11 = sshll.u32 (!%p1425_p7), %s189_s25, 5  ;;  %s190_s15 = scalar_lea.sflag (!%p1425_p7), [#allocation4], %s189_s25 }
  0x62   : > { %s1269_s23 = scalar_lea.vmem (!%p1425_p7), [#allocation3], %s650_s11  ;;  %p1426_p9 = scmp.ne.s32.totalorder (!%p1425_p7), %s1412_s29, 0 }
  0x67   : > { %997 = dma.done.wait (%p1426_p9), %s190_s15, 512  }
  0x68   : > { %999 = vsyncadd (%p1426_p9), %s190_s15, 4294966784  ;;  %p1427_p1 = scmp.ne.s32.totalorder %s1410_s26, 0 }
  0x6a   : > { %1001 = dma.done.wait (%p1427_p1), [#allocation7], 2048  }
  0x6b   : > { %1003 = vsyncadd (%p1427_p1), [#allocation7], 4294965248  ;;  %s217_s12 = sand.u32 1, %s1014_s13   ;;  %p653_p5 = scmp.ne.s32.totalorder %s1034_s18, 0 }
  0x6c   : > { %s652_s20 = sshll.u32 %s217_s12, 7  ;;  %v1059_v0 = vmov (!%p653_p5), 0.0  }
  0x6d   : > { %s1282_s5 = scalar_lea.vmem [#allocation8], %s652_s20  ;;  %226 = sbr.rel (%p653_p5) target bundleno = 117 (0x75), region = 44  ;;  %227 = vst [vmem:[#allocation2] sm:$0xff] (!%p653_p5), %v1059_v0  ;;  %228 = vst [vmem:[#allocation2 + $0x8] sm:$0xff] (!%p653_p5), %v1059_v0 }
  0x6e   : > { %229 = vst [vmem:[#allocation2 + $0x10] sm:$0xff] (!%p653_p5), %v1059_v0  ;;  %230 = vst [vmem:[#allocation2 + $0x18] sm:$0xff] (!%p653_p5), %v1059_v0 }
  0x6f   : > { %231 = vst [vmem:[#allocation2 + $0x20] sm:$0xff] (!%p653_p5), %v1059_v0  ;;  %232 = vst [vmem:[#allocation2 + $0x28] sm:$0xff] (!%p653_p5), %v1059_v0 }
  0x70   : > { %233 = vst [vmem:[#allocation2 + $0x30] sm:$0xff] (!%p653_p5), %v1059_v0  ;;  %234 = vst [vmem:[#allocation2 + $0x38] sm:$0xff] (!%p653_p5), %v1059_v0 }
  0x71   : > { %235 = vst [vmem:[#allocation2 + $0x40] sm:$0xff] (!%p653_p5), %v1059_v0  ;;  %236 = vst [vmem:[#allocation2 + $0x48] sm:$0xff] (!%p653_p5), %v1059_v0 }
  0x72   : > { %237 = vst [vmem:[#allocation2 + $0x50] sm:$0xff] (!%p653_p5), %v1059_v0  ;;  %238 = vst [vmem:[#allocation2 + $0x58] sm:$0xff] (!%p653_p5), %v1059_v0 }
  0x73   : > { %239 = vst [vmem:[#allocation2 + $0x60] sm:$0xff] (!%p653_p5), %v1059_v0  ;;  %240 = vst [vmem:[#allocation2 + $0x68] sm:$0xff] (!%p653_p5), %v1059_v0 }
  0x74   : > { %241 = vst [vmem:[#allocation2 + $0x70] sm:$0xff] %v1059_v0  ;;  %242 = vst [vmem:[#allocation2 + $0x78] sm:$0xff] %v1059_v0 }
  0x75 PF: > { %s654_s26 = sshll.u32 %s1034_s18, 7  ;;  %v243_v1 = vld [vmem:[%s1269_s23] sm:$0xff]  ;;  %v245_v2 = vld [vmem:[%s1269_s23 + $0x10] sm:$0xff]  ;;  %v244_v13 = vld [vmem:[%s1269_s23 + $0x8] sm:$0xff]  ;;  %p664_p4 = scmp.ne.s32.totalorder %s1034_s18, 1 }
  0x76   : > { %s256_s29 = sshra.s32 %s654_s26, 3  ;;  %v247_v3 = vunpack.c.l.s8.bf16 %v243_v1  ;;  %v251_v4 = vunpack.c.l.s8.bf16 %v245_v2  ;;  %v246_v14 = vld [vmem:[%s1269_s23 + $0x18] sm:$0xff]  ;;  %v248_v15 = vunpack.c.h.s8.bf16 %v243_v1  ;;  %v252_v16 = vunpack.c.h.s8.bf16 %v245_v2  ;;  %v278_v21 = vld [vmem:[#allocation2 + $0x10] sm:$0xff]  ;;  %v276_v23 = vld [vmem:[#allocation2] sm:$0xff] }
  0x77   : > { %s655_s9 = sshll.u32 %s256_s29, 2  ;;  %v249_v17 = vunpack.c.l.s8.bf16 %v244_v13  ;;  %v253_v18 = vunpack.c.l.s8.bf16 %v246_v14  ;;  %v250_v19 = vunpack.c.h.s8.bf16 %v244_v13  ;;  %v254_v20 = vunpack.c.h.s8.bf16 %v246_v14  ;;  %v279_v27 = vld [vmem:[#allocation2 + $0x18] sm:$0xff]  ;;  %v277_v33 = vld [vmem:[#allocation2 + $0x8] sm:$0xff]  ;;  %v280_v47 = vld [vmem:[#allocation2 + $0x20] sm:$0xff] }
  0x78   : > { %705 = vmatprep.mubr.bf16.mxu0 %v247_v3  ;;  %713 = vmatprep.mubr.bf16.mxu1 %v251_v4  ;;  %s1288_s10 = scalar_lea.vmem [#allocation6], %s655_s9  ;;  %v282_v45 = vld [vmem:[#allocation2 + $0x30] sm:$0xff]  ;;  %v283_v51 = vld [vmem:[#allocation2 + $0x38] sm:$0xff]  ;;  %v281_v57 = vld [vmem:[#allocation2 + $0x28] sm:$0xff] }
  0x79   : > { %v858_v5 = vld [vmem:[%s1288_s10] sm:$0xff]   ;;  %v859_v6 = vld [vmem:[%s1288_s10 + $0x8] sm:$0xff]   ;;  %v860_v7 = vld [vmem:[%s1288_s10 + $0x10] sm:$0xff]  }
  0x7a   : > { %689 = vmatprep.subr.bf16.mxu0 %v858_v5  ;;  %721 = vmatprep.subr.bf16.mxu1 %v858_v5  ;;  %v861_v8 = vld [vmem:[%s1288_s10 + $0x18] sm:$0xff]   ;;  %v862_v9 = vld [vmem:[%s1288_s10 + $0x20] sm:$0xff]   ;;  %v863_v10 = vld [vmem:[%s1288_s10 + $0x28] sm:$0xff]  }
  0x7b   : > { %690 = vmatpush3.bf16.msra.mxu0 %v858_v5  ;;  %729 = vmatpush3.bf16.msra.mxu1 %v858_v5  ;;  %v864_v11 = vld [vmem:[%s1288_s10 + $0x30] sm:$0xff]   ;;  %v865_v12 = vld [vmem:[%s1288_s10 + $0x38] sm:$0xff]   ;;  %v284_v24 = vld [vmem:[#allocation2 + $0x40] sm:$0xff] }
  0x7c   : > { %691 = vmatprep.subr.bf16.mxu0 %v859_v6  ;;  %722 = vmatprep.subr.bf16.mxu1 %v859_v6  ;;  %v286_v22 = vld [vmem:[#allocation2 + $0x50] sm:$0xff]  ;;  %v287_v28 = vld [vmem:[#allocation2 + $0x58] sm:$0xff]  ;;  %v285_v34 = vld [vmem:[#allocation2 + $0x48] sm:$0xff] }
  0x7d   : > { %v290_v46 = vld [vmem:[#allocation2 + $0x70] sm:$0xff]  ;;  %v288_v48 = vld [vmem:[#allocation2 + $0x60] sm:$0xff]  ;;  %v291_v52 = vld [vmem:[#allocation2 + $0x78] sm:$0xff] }
  0x7e   : > { %v289_v58 = vld [vmem:[#allocation2 + $0x68] sm:$0xff] }
  0x7f   : > { %692 = vmatpush3.bf16.msra.mxu0 %v859_v6  ;;  %730 = vmatpush3.bf16.msra.mxu1 %v859_v6  ;;  %v665_v6 = vld [vmem:[%s1394_s2] ss:$0 sm:$0xff] (!%p664_p4) }
  0x80   : > { %693 = vmatprep.subr.bf16.mxu0 %v860_v7  ;;  %723 = vmatprep.subr.bf16.mxu1 %v860_v7 }
  0x83   : > { %694 = vmatpush3.bf16.msra.mxu0 %v860_v7  ;;  %731 = vmatpush3.bf16.msra.mxu1 %v860_v7 }
  0x84   : > { %695 = vmatprep.subr.bf16.mxu0 %v861_v8  ;;  %724 = vmatprep.subr.bf16.mxu1 %v861_v8 }
  0x87   : > { %696 = vmatpush3.bf16.msra.mxu0 %v861_v8  ;;  %732 = vmatpush3.bf16.msra.mxu1 %v861_v8 }
  0x88   : > { %697 = vmatprep.subr.bf16.mxu0 %v862_v9  ;;  %725 = vmatprep.subr.bf16.mxu1 %v862_v9 }
  0x8b   : > { %698 = vmatpush3.bf16.msra.mxu0 %v862_v9  ;;  %733 = vmatpush3.bf16.msra.mxu1 %v862_v9 }
  0x8c   : > { %699 = vmatprep.subr.bf16.mxu0 %v863_v10  ;;  %726 = vmatprep.subr.bf16.mxu1 %v863_v10 }
  0x8f   : > { %700 = vmatpush3.bf16.msra.mxu0 %v863_v10  ;;  %734 = vmatpush3.bf16.msra.mxu1 %v863_v10 }
  0x90   : > { %701 = vmatprep.subr.bf16.mxu0 %v864_v11  ;;  %727 = vmatprep.subr.bf16.mxu1 %v864_v11 }
  0x93   : > { %702 = vmatpush3.bf16.msra.mxu0 %v864_v11  ;;  %735 = vmatpush3.bf16.msra.mxu1 %v864_v11 }
  0x94   : > { %703 = vmatprep.subr.bf16.mxu0 %v865_v12  ;;  %728 = vmatprep.subr.bf16.mxu1 %v865_v12 }
  0x97   : > { %704 = vmatpush3.bf16.msra.mxu0 %v865_v12  ;;  %736 = vmatpush3.bf16.msra.mxu1 %v865_v12 }
  0x9a   : > { %706 = vmatmul.mubr.bf16.vlgmr.msra.gmra.mrb[0].mxu0 %v248_v15  ;;  %714 = vmatmul.mubr.bf16.vlgmr.msra.gmra.mrb[0].mxu1 %v252_v16 }
  0x9b   : > { %709 = vmatprep.mubr.bf16.mxu0 %v249_v17  ;;  %717 = vmatprep.mubr.bf16.mxu1 %v253_v18 }
  0xa2   : > { %710 = vmatmul.mubr.bf16.gmra.mrb[4].mxu0 %v250_v19  ;;  %718 = vmatmul.mubr.bf16.gmra.mrb[4].mxu1 %v254_v20 }
 0x16d   : > { %v707_v25 = vpop.f32.mrb[0].mxu0  ;;  %v715_v26 = vpop.f32.mrb[0].mxu1 }
 0x16e   : > { %v439_v29 = vadd.f32 %v707_v25, %v278_v21  ;;  %v447_v30 = vadd.f32 %v715_v26, %v286_v22  ;;  %v374_v31 = vpop.f32.mrb[1].mxu0  ;;  %v406_v32 = vpop.f32.mrb[1].mxu1 }
 0x16f   : > { %v437_v35 = vadd.f32 %v374_v31, %v276_v23  ;;  %v445_v36 = vadd.f32 %v406_v32, %v284_v24  ;;  %v708_v37 = vpop.f32.mrb[2].mxu0  ;;  %v716_v38 = vpop.f32.mrb[2].mxu1 }
 0x170   : > { %455 = vst [vmem:[#allocation2 + $0x10] sm:$0xff] %v439_v29  ;;  %463 = vst [vmem:[#allocation2 + $0x50] sm:$0xff] %v447_v30  ;;  %v440_v39 = vadd.f32 %v708_v37, %v279_v27  ;;  %v448_v40 = vadd.f32 %v716_v38, %v287_v28  ;;  %v377_v41 = vpop.f32.mrb[3].mxu0  ;;  %v409_v42 = vpop.f32.mrb[3].mxu1 }
 0x171   : > { %453 = vst [vmem:[#allocation2] sm:$0xff] %v437_v35  ;;  %461 = vst [vmem:[#allocation2 + $0x40] sm:$0xff] %v445_v36  ;;  %v438_v43 = vadd.f32 %v377_v41, %v277_v33  ;;  %v446_v44 = vadd.f32 %v409_v42, %v285_v34 }
 0x172   : > { %456 = vst [vmem:[#allocation2 + $0x18] sm:$0xff] %v440_v39  ;;  %464 = vst [vmem:[#allocation2 + $0x58] sm:$0xff] %v448_v40 }
 0x173   : > { %454 = vst [vmem:[#allocation2 + $0x8] sm:$0xff] %v438_v43  ;;  %462 = vst [vmem:[#allocation2 + $0x48] sm:$0xff] %v446_v44 }
 0x175   : > { %v711_v49 = vpop.f32.mrb[4].mxu0  ;;  %v719_v50 = vpop.f32.mrb[4].mxu1  ;;  %472 = sbr.rel (%p664_p4) target bundleno = 391 (0x187), region = 48 }
 0x176   : > { %v443_v53 = vadd.f32 %v711_v49, %v282_v45  ;;  %v451_v54 = vadd.f32 %v719_v50, %v290_v46  ;;  %v390_v55 = vpop.f32.mrb[5].mxu0  ;;  %v422_v56 = vpop.f32.mrb[5].mxu1 }
 0x177   : > { %v441_v59 = vadd.f32 %v390_v55, %v280_v47  ;;  %v449_v60 = vadd.f32 %v422_v56, %v288_v48  ;;  %v712_v61 = vpop.f32.mrb[6].mxu0  ;;  %v720_v62 = vpop.f32.mrb[6].mxu1  ;;  %v475_v10 = vld [vmem:[#allocation2 + $0x10] sm:$0xff] (!%p664_p4) }
 0x178   : > { %459 = vst [vmem:[#allocation2 + $0x30] sm:$0xff] %v443_v53  ;;  %467 = vst [vmem:[#allocation2 + $0x70] sm:$0xff] %v451_v54  ;;  %v444_v63 = vadd.f32 %v712_v61, %v283_v51  ;;  %v452_v0 = vadd.f32 %v720_v62, %v291_v52  ;;  %v393_v1 = vpop.f32.mrb[7].mxu0  ;;  %v425_v2 = vpop.f32.mrb[7].mxu1  ;;  %v473_v5 = vld [vmem:[#allocation2] sm:$0xff] (!%p664_p4)  ;;  %v498_v13 = vadd.f32 (!%p664_p4), %v665_v6, %v475_v10  ;;  %v483_v24 = vld [vmem:[#allocation2 + $0x50] sm:$0xff] (!%p664_p4) }
 0x179   : > { %457 = vst [vmem:[#allocation2 + $0x20] sm:$0xff] %v441_v59  ;;  %465 = vst [vmem:[#allocation2 + $0x60] sm:$0xff] %v449_v60  ;;  %v442_v3 = vadd.f32 %v393_v1, %v281_v57  ;;  %v450_v4 = vadd.f32 %v425_v2, %v289_v58  ;;  %v496_v8 = vadd.f32 (!%p664_p4), %v665_v6, %v473_v5  ;;  %v476_v11 = vld [vmem:[#allocation2 + $0x18] sm:$0xff] (!%p664_p4)  ;;  %v481_v22 = vld [vmem:[#allocation2 + $0x40] sm:$0xff] (!%p664_p4) }
 0x17a   : > { %460 = vst [vmem:[#allocation2 + $0x38] sm:$0xff] %v444_v63  ;;  %468 = vst [vmem:[#allocation2 + $0x78] sm:$0xff] %v452_v0  ;;  %v474_v7 = vld [vmem:[#allocation2 + $0x8] sm:$0xff] (!%p664_p4)  ;;  %v499_v14 = vadd.f32 (!%p664_p4), %v665_v6, %v476_v11  ;;  %v504_v25 = vadd.f32 (!%p664_p4), %v665_v6, %v481_v22  ;;  %v506_v27 = vadd.f32 (!%p664_p4), %v665_v6, %v483_v24  ;;  %v484_v28 = vld [vmem:[#allocation2 + $0x58] sm:$0xff] (!%p664_p4) }
 0x17b   : > { %458 = vst [vmem:[#allocation2 + $0x28] sm:$0xff] %v442_v3  ;;  %466 = vst [vmem:[#allocation2 + $0x68] sm:$0xff] %v450_v4  ;;  %v497_v9 = vadd.f32 (!%p664_p4), %v665_v6, %v474_v7  ;;  %v482_v23 = vld [vmem:[#allocation2 + $0x48] sm:$0xff] (!%p664_p4)  ;;  %v507_v31 = vadd.f32 (!%p664_p4), %v665_v6, %v484_v28 }
 0x17c   : > { %512 = vst [vmem:[%s1282_s5] sm:$0xff] %v496_v8  ;;  %514 = vst [vmem:[%s1282_s5 + $0x10] sm:$0xff] %v498_v13  ;;  %v505_v26 = vadd.f32 %v665_v6, %v482_v23 }
 0x17d   : > { %513 = vst [vmem:[%s1282_s5 + $0x8] sm:$0xff] %v497_v9  ;;  %515 = vst [vmem:[%s1282_s5 + $0x18] sm:$0xff] %v499_v14 }
 0x17e   : > { %520 = vst [vmem:[%s1282_s5 + $0x40] sm:$0xff] %v504_v25  ;;  %521 = vst [vmem:[%s1282_s5 + $0x48] sm:$0xff] %v505_v26 }
 0x17f   : > { %v479_v17 = vld [vmem:[#allocation2 + $0x30] sm:$0xff]  ;;  %522 = vst [vmem:[%s1282_s5 + $0x50] sm:$0xff] %v506_v27  ;;  %523 = vst [vmem:[%s1282_s5 + $0x58] sm:$0xff] %v507_v31 }
 0x180   : > { %v477_v12 = vld [vmem:[#allocation2 + $0x20] sm:$0xff]  ;;  %v502_v20 = vadd.f32 %v665_v6, %v479_v17  ;;  %v487_v34 = vld [vmem:[#allocation2 + $0x70] sm:$0xff] }
 0x181   : > { %v500_v15 = vadd.f32 %v665_v6, %v477_v12  ;;  %v480_v18 = vld [vmem:[#allocation2 + $0x38] sm:$0xff]  ;;  %v485_v29 = vld [vmem:[#allocation2 + $0x60] sm:$0xff]  ;;  %v510_v36 = vadd.f32 %v665_v6, %v487_v34 }
 0x182   : > { %v478_v16 = vld [vmem:[#allocation2 + $0x28] sm:$0xff]  ;;  %v503_v21 = vadd.f32 %v665_v6, %v480_v18  ;;  %518 = vst [vmem:[%s1282_s5 + $0x30] sm:$0xff] %v502_v20  ;;  %v508_v32 = vadd.f32 %v665_v6, %v485_v29  ;;  %v488_v35 = vld [vmem:[#allocation2 + $0x78] sm:$0xff] }
 0x183   : > { %v501_v19 = vadd.f32 %v665_v6, %v478_v16  ;;  %516 = vst [vmem:[%s1282_s5 + $0x20] sm:$0xff] %v500_v15  ;;  %v486_v30 = vld [vmem:[#allocation2 + $0x68] sm:$0xff]  ;;  %v511_v37 = vadd.f32 %v665_v6, %v488_v35  ;;  %526 = vst [vmem:[%s1282_s5 + $0x70] sm:$0xff] %v510_v36 }
 0x184   : > { %519 = vst [vmem:[%s1282_s5 + $0x38] sm:$0xff] %v503_v21  ;;  %v509_v33 = vadd.f32 %v665_v6, %v486_v30  ;;  %524 = vst [vmem:[%s1282_s5 + $0x60] sm:$0xff] %v508_v32 }
 0x185   : > { %517 = vst [vmem:[%s1282_s5 + $0x28] sm:$0xff] %v501_v19  ;;  %527 = vst [vmem:[%s1282_s5 + $0x78] sm:$0xff] %v511_v37 }
 0x186   : > { %525 = vst [vmem:[%s1282_s5 + $0x68] sm:$0xff] %v509_v33 }
 0x187 PF: > { %s672_s18 = sshll.u32 %s1038_s19, 11  ;;  %s542_s27 = sshll.u32 %s1282_s5, 4  ;;  %s1327_s27 = int_to_ptr.vmem [resolvable:$true] %s542_s27 }
 0x188   : > { %s1324_s1 = scalar_lea.hbm %s1395_s3, %s672_s18  ;;  %s1331_s25 = scalar_lea.sflag [#allocation5], %s217_s12 }
 0x189   : > { %s924_s11 = scalar_lea.vmem %s1327_s27, 2048  ;;  %p1428_p3 = scmp.ne.s32.totalorder %s1413_s30, 0 }
 0x18a   : > { %p925_p2 = scmp.ne.s32.totalorder %s1327_s27, %s924_s11  ;;  %s1060_s19 = smov [#allocation8]  }
 0x18b   : > { %s928_s15 = sshll.u32 %s1060_s19, 4  ;;  %s929_s15 = int_to_ptr.vmem [resolvable:$false] %s928_s15 }
 0x18c   : > { %p926_p6 = pnand %p925_p2, %p1428_p3  ;;  %s930_s23 = scalar_lea.vmem %s929_s15, 4096 }
 0x18d   : > { %p931_p12 = scmp.lt.s32.totalorder %s1327_s27, %s929_s15  ;;  %p932_p0 = scmp.lt.s32.totalorder %s930_s23, %s924_s11 }
 0x18e   : > { %p927_p10 = pneg %p926_p6 }
 0x18f   : > { %p933_p8 = por %p932_p0, %p931_p12 }
 0x191   : > { %p934_p11 = pnand %p933_p8, %p927_p10 }
 0x193   : > { %937 = shalt.err (!%p934_p11)
}
 0x194   : > { %s938_s12 = scalar_lea.hbm %s1324_s1, 2048  ;;  %s942_s26 = scalar_lea.hbm %s1395_s3, 4096 }
 0x195   : > { %p939_p13 = scmp.ne.s32.totalorder %s1324_s1, %s938_s12  ;;  %p943_p1 = scmp.lt.u32.totalorder %s1324_s1, %s1395_s3 }
 0x196   : > { %p944_p5 = scmp.lt.u32.totalorder %s942_s26, %s938_s12  ;;  %p946_p2 = scmp.lt.u32.totalorder %s938_s12, %s1324_s1 }
 0x197   : > { %p940_p7 = pnand %p939_p13, %p1428_p3 }
 0x198   : > { %p945_p4 = por %p944_p5, %p943_p1 }
 0x199   : > { %p941_p9 = pneg %p940_p7 }
 0x19a   : > { %p947_p6 = por %p946_p2, %p945_p4 }
 0x19c   : > { %p948_p10 = pnand %p947_p6, %p941_p9 }
 0x19e   : > { %951 = shalt.err (!%p948_p10)
}
 0x19f   : > { %s1061_s10 = smov 128   ;;  %s1062_s6 = smov 8  }
 0x1a0   : > { %743 = dma.vmem_to_hbm [thread:$0]  (%p1428_p3), %s1327_s27, 2048, %s1324_s1, %s1331_s25, %s1061_s10, %s1061_s10, %s1062_s6  }
 0x1a1 PF: > { %s1429_s8 = sld [smem:[#allocation12_spill]]  ;;  %s1430_s18 = sld [smem:[#allocation14_spill]] }
 0x1a2   : > { %p760_p12 = scmp.ge.s32.totalorder %s1050_s22, 2 }
 0x1a7   : > { %s557_s28 = sand.u32 1, %s1429_s8   ;;  %p1431_p0 = scmp.ne.s32.totalorder %s1430_s18, 0 }
 0x1a8   : > { %s558_s24 = scalar_lea.sflag [#allocation5], %s557_s28 }
 0x1a9   : > { %p754_p8 = pnand %p760_p12, %p1431_p0 }
 0x1ab   : > { %1005 = dma.done.wait (!%p754_p8), %s558_s24, 2048  }
 0x1ac   : > { %1007 = vsyncadd (!%p754_p8), %s558_s24, 4294965248  ;;  %s20_s22 = sadd.s32 1, %s1050_s22   ;;  %s1432_s18 = sld [smem:[#allocation13_spill]] }
 0x1ad   : > { %p17_p11 = scmp.ge.s32.totalorder %s20_s22, 6   ;;  %s1433_s20 = sld [smem:[#allocation15_spill]] }
 0x1ae   : > { %s1434_s30 = sld [smem:[#allocation16_spill]]  ;;  %s1435_s12 = smov %s1014_s13 }
 0x1af   : > { %s1436_s13 = smov %s1018_s14  ;;  %s1437_s14 = smov %s1231_s7 }
 0x1b0   : > { %s1438_s15 = smov %s1026_s16  ;;  %s1439_s16 = smov %s1030_s17 }
 0x1b1   : > { %s1440_s17 = smov %s1236_s4  ;;  %s1441_s19 = smov %s1046_s21 }
 0x1b2   :  { %19 = sbr.rel (!%p17_p11) target bundleno = 12 (0xc), region = 90 }
 0x1b4   : > { %s1442_s21 = smov %s1434_s30 }
 0x1b9   :  { %563 = vsyncpa [#allocation4], 1 }
 0x1ba   :  { %565 = vsyncpa [#allocation4 + $0x1], 1 }
 0x1bb   :  { %566 = vsyncpa [#allocation7], 1 }
 0x1bc   :  { %567 = vsyncpa [#allocation5], 1 }
 0x1bd   :  { %569 = vsyncpa [#allocation5 + $0x1], 1 }

</bundles_post_ra>
